<compile_context>
chip_gen: v5e
topology: v5e:2x2
jax: 0.10.0
libtpu: 0.0.40
codegen_flags: <defaults>
</compile_context>

<pallas_src>
import functools

import jax
import jax.numpy as jnp
from jax import lax
from jax.experimental import pallas as pl
from jax.experimental.pallas import tpu as pltpu


def _smooth_circles_kernel(means_ref, sigmas_ref, colors_ref, o_ref, *,
                           n_circles, width, flat):
    j = pl.program_id(0)
    _, tile_rows, lane = o_ref.shape

    # ---- in-kernel coordinate generation (replaces DMA'd X / Y buffers) ----
    r_idx = lax.broadcasted_iota(jnp.int32, (tile_rows, lane), 0) + j * tile_rows
    l_idx = lax.broadcasted_iota(jnp.int32, (tile_rows, lane), 1)
    if flat:
        # lane-dense flattened layout: flat pixel p = r*128 + l, W power of two,
        # so row/col come from shift/mask (no vector integer division).
        shift = width.bit_length() - 1            # log2(W)
        p = r_idx * lane + l_idx
        row = p >> shift
        col = p & (width - 1)
    else:
        # natural (W, W) layout: sublane axis = image row, lane axis = column
        row = r_idx
        col = l_idx
    scale = 2.0 / (width - 1)                     # linspace(-1, 1, W) step
    Xg = row.astype(jnp.float32) * scale - 1.0    # torch.meshgrid indexing='ij'
    Yg = col.astype(jnp.float32) * scale - 1.0

    # ---- unrolled circle loop with vreg-carried per-channel accumulators ----
    def body(i, acc):
        a0, a1, a2 = acc
        mx = means_ref[i, 0]
        my = means_ref[i, 1]
        s = sigmas_ref[i]
        inv_s2 = 1.0 / (s * s)                    # scalar; no per-pixel divide
        amp = (1.0 / 6.0) * inv_s2
        neg_inv_s2 = -inv_s2                      # fold negate into the scalar
        dx = Xg - mx
        dy = Yg - my
        z = amp * jnp.exp((dx * dx + dy * dy) * neg_inv_s2)
        return (a0 + z * colors_ref[i, 0],
                a1 + z * colors_ref[i, 1],
                a2 + z * colors_ref[i, 2])

    zero = jnp.zeros((tile_rows, lane), jnp.float32)
    a0, a1, a2 = lax.fori_loop(0, n_circles, body, (zero, zero, zero),
                               unroll=True)

    # ---- finalize: 1 - mean over circles; one store per channel ----
    inv_n = 1.0 / n_circles
    o_ref[0] = 1.0 - a0 * inv_n
    o_ref[1] = 1.0 - a1 * inv_n
    o_ref[2] = 1.0 - a2 * inv_n


def smooth_circles(means, sigmas, colors, width):
    """means (n,2) f32, sigmas (n,) f32, colors (n,3) f32 -> (1,3,W,W) f32."""
    n = int(means.shape[0])
    W = int(width)
    LANE = 128

    # Small power-of-two widths: flatten pixels to a lane-dense (W*W/128, 128)
    # slab so output stores are unmasked. Otherwise keep natural (W, W) rows
    # (lane dim = W, already dense whenever W >= 128).
    flat = (W < LANE) and (W & (W - 1) == 0) and ((W * W) % LANE == 0)
    if flat:
        n_rows, lane = (W * W) // LANE, LANE
    else:
        n_rows, lane = W, W

    # Spatial tiling over the row axis; "parallel" grid axis (2 TCs on v7x),
    # sized so output block + accumulators stay well under scoped VMEM.
    MAX_TILE_ROWS = 128
    if n_rows <= MAX_TILE_ROWS:
        tile_rows, num_tiles = n_rows, 1
    else:
        tile_rows = MAX_TILE_ROWS                 # multiple of 8
        num_tiles = pl.cdiv(n_rows, tile_rows)
    rows_pad = num_tiles * tile_rows              # padded rows (cropped below)

    kernel = functools.partial(_smooth_circles_kernel,
                               n_circles=n, width=W, flat=flat)
    out = pl.pallas_call(
        kernel,
        out_shape=jax.ShapeDtypeStruct((3, rows_pad, lane), jnp.float32),
        grid_spec=pltpu.PrefetchScalarGridSpec(
            num_scalar_prefetch=0,
            grid=(num_tiles,),
            in_specs=[
                pl.BlockSpec(memory_space=pltpu.MemorySpace.SMEM),  # means  (n,2)
                pl.BlockSpec(memory_space=pltpu.MemorySpace.SMEM),  # sigmas (n,)
                pl.BlockSpec(memory_space=pltpu.MemorySpace.SMEM),  # colors (n,3)
            ],
            out_specs=pl.BlockSpec((3, tile_rows, lane), lambda j: (0, j, 0)),
        ),
        compiler_params=pltpu.CompilerParams(
            dimension_semantics=("parallel",)),
    )(means, sigmas, colors)

    if flat:
        img = out.reshape(3, rows_pad * lane)[:, : W * W].reshape(3, W, W)
    else:
        img = out[:, :W, :]
    return img[None]                              # (1, 3, W, W) NCHW


def smooth_circles_ref(means, sigmas, colors, X, Y):
    """Pure-JAX reference matching the PyTorch forward."""
    d2 = (((X[None] - means[:, 0, None, None]) / sigmas[:, None, None]) ** 2 +
          ((Y[None] - means[:, 1, None, None]) / sigmas[:, None, None]) ** 2)
    z = 1.0 / 6.0 / (sigmas[:, None, None] ** 2) * jnp.exp(-d2)   # (n, W, W)
    z = z[:, None, :, :] * colors[:, :, None, None]               # (n, 3, W, W)
    return (1.0 - z.mean(axis=0))[None]                           # (1, 3, W, W)


if __name__ == "__main__":
    width = 16
    n = 5

    # deterministic parameter init (mirrors shapes in _SmoothCircle.__init__)
    key = jax.random.PRNGKey(0)
    kmean, ksigma, kcolor = jax.random.split(key, 3)
    means = 0.5 * jax.random.normal(kmean, (n, 2), dtype=jnp.float32)
    sigmas = 0.1 + 0.1 * jax.random.uniform(ksigma, (n,), dtype=jnp.float32)
    colors = jax.random.uniform(kcolor, (n, 3), dtype=jnp.float32)

    out = smooth_circles(means, sigmas, colors, width)
    out = jax.block_until_ready(out)

    # reference uses the module's linspace/meshgrid ('ij') coordinate buffers
    lin = jnp.linspace(-1.0, 1.0, width, dtype=jnp.float32)
    X, Y = jnp.meshgrid(lin, lin, indexing="ij")
    ref = smooth_circles_ref(means, sigmas, colors, X, Y)

    assert out.shape == (1, 3, width, width)
    assert jnp.allclose(out, ref, atol=1e-4, rtol=1e-4), float(
        jnp.max(jnp.abs(out - ref)))

    print("KERNEL_OK")
</pallas_src>

<mosaic_0001>
module attributes {stable_mosaic.version = 11 : i64} {
  func.func @_smooth_circles_kernel(%arg0: i32, %arg1: memref<5x2xf32, #tpu.memory_space<smem>>, %arg2: memref<5xf32, #tpu.memory_space<smem>>, %arg3: memref<5x3xf32, #tpu.memory_space<smem>>, %arg4: memref<3x2x128xf32, #tpu.memory_space<vmem>>) attributes {dimension_semantics = [#tpu.dimension_semantics<parallel>], iteration_bounds = array<i64: 1>, scalar_prefetch = 0 : i64, scratch_operands = 0 : i64, tpu.core_type = #tpu.core_type<tc>, window_params = [{transform_indices = @transform_0, window_bounds = array<i64: 5, 2>}, {transform_indices = @transform_1, window_bounds = array<i64: 5>}, {transform_indices = @transform_2, window_bounds = array<i64: 5, 3>}, {transform_indices = @transform_3, window_bounds = array<i64: 3, 2, 128>}]} {
    %0 = tpu.iota {dimensions = array<i32: 0>} : vector<2x128xi32>
    %c2_i32 = arith.constant 2 : i32
    %1 = arith.muli %arg0, %c2_i32 : i32
    %2 = vector.broadcast %1 : i32 to vector<2x128xi32>
    %3 = arith.addi %0, %2 : vector<2x128xi32>
    %4 = tpu.iota {dimensions = array<i32: 1>} : vector<2x128xi32>
    %c128_i32 = arith.constant 128 : i32
    %5 = vector.broadcast %c128_i32 : i32 to vector<2x128xi32>
    %6 = arith.muli %3, %5 : vector<2x128xi32>
    %7 = arith.addi %6, %4 : vector<2x128xi32>
    %c4_i32 = arith.constant 4 : i32
    %8 = vector.broadcast %c4_i32 : i32 to vector<2x128xi32>
    %9 = arith.shrsi %7, %8 : vector<2x128xi32>
    %c15_i32 = arith.constant 15 : i32
    %10 = vector.broadcast %c15_i32 : i32 to vector<2x128xi32>
    %11 = arith.andi %7, %10 : vector<2x128xi32>
    %12 = arith.sitofp %9 : vector<2x128xi32> to vector<2x128xf32>
    %cst = arith.constant 0.13333334 : f32
    %13 = vector.broadcast %cst : f32 to vector<2x128xf32>
    %14 = arith.mulf %12, %13 : vector<2x128xf32>
    %cst_0 = arith.constant 1.000000e+00 : f32
    %15 = vector.broadcast %cst_0 : f32 to vector<2x128xf32>
    %16 = arith.subf %14, %15 : vector<2x128xf32>
    %17 = arith.sitofp %11 : vector<2x128xi32> to vector<2x128xf32>
    %cst_1 = arith.constant 0.13333334 : f32
    %18 = vector.broadcast %cst_1 : f32 to vector<2x128xf32>
    %19 = arith.mulf %17, %18 : vector<2x128xf32>
    %cst_2 = arith.constant 1.000000e+00 : f32
    %20 = vector.broadcast %cst_2 : f32 to vector<2x128xf32>
    %21 = arith.subf %19, %20 : vector<2x128xf32>
    %cst_3 = arith.constant 0.000000e+00 : f32
    %22 = vector.broadcast %cst_3 : f32 to vector<2x128xf32>
    %c0_i32 = arith.constant 0 : i32
    %23 = arith.index_cast %c0_i32 : i32 to index
    %c0 = arith.constant 0 : index
    %24 = memref.load %arg1[%23, %c0] : memref<5x2xf32, #tpu.memory_space<smem>>
    %25 = arith.index_cast %c0_i32 : i32 to index
    %c1 = arith.constant 1 : index
    %26 = memref.load %arg1[%25, %c1] : memref<5x2xf32, #tpu.memory_space<smem>>
    %27 = arith.index_cast %c0_i32 : i32 to index
    %28 = memref.load %arg2[%27] : memref<5xf32, #tpu.memory_space<smem>>
    %29 = arith.mulf %28, %28 : f32
    %cst_4 = arith.constant 1.000000e+00 : f32
    %30 = arith.divf %cst_4, %29 : f32
    %cst_5 = arith.constant 0.166666672 : f32
    %31 = arith.mulf %cst_5, %30 : f32
    %cst_6 = arith.constant 0.000000e+00 : f32
    %32 = arith.subf %cst_6, %30 : f32
    %33 = vector.broadcast %24 : f32 to vector<2x128xf32>
    %34 = arith.subf %16, %33 : vector<2x128xf32>
    %35 = vector.broadcast %26 : f32 to vector<2x128xf32>
    %36 = arith.subf %21, %35 : vector<2x128xf32>
    %37 = arith.mulf %34, %34 : vector<2x128xf32>
    %38 = arith.mulf %36, %36 : vector<2x128xf32>
    %39 = arith.addf %37, %38 : vector<2x128xf32>
    %40 = vector.broadcast %32 : f32 to vector<2x128xf32>
    %41 = arith.mulf %39, %40 : vector<2x128xf32>
    %42 = math.exp %41 : vector<2x128xf32>
    %43 = vector.broadcast %31 : f32 to vector<2x128xf32>
    %44 = arith.mulf %43, %42 : vector<2x128xf32>
    %45 = arith.index_cast %c0_i32 : i32 to index
    %c0_7 = arith.constant 0 : index
    %46 = memref.load %arg3[%45, %c0_7] : memref<5x3xf32, #tpu.memory_space<smem>>
    %47 = vector.broadcast %46 : f32 to vector<2x128xf32>
    %48 = arith.mulf %44, %47 : vector<2x128xf32>
    %49 = arith.addf %22, %48 : vector<2x128xf32>
    %50 = arith.index_cast %c0_i32 : i32 to index
    %c1_8 = arith.constant 1 : index
    %51 = memref.load %arg3[%50, %c1_8] : memref<5x3xf32, #tpu.memory_space<smem>>
    %52 = vector.broadcast %51 : f32 to vector<2x128xf32>
    %53 = arith.mulf %44, %52 : vector<2x128xf32>
    %54 = arith.addf %22, %53 : vector<2x128xf32>
    %55 = arith.index_cast %c0_i32 : i32 to index
    %c2 = arith.constant 2 : index
    %56 = memref.load %arg3[%55, %c2] : memref<5x3xf32, #tpu.memory_space<smem>>
    %57 = vector.broadcast %56 : f32 to vector<2x128xf32>
    %58 = arith.mulf %44, %57 : vector<2x128xf32>
    %59 = arith.addf %22, %58 : vector<2x128xf32>
    %c1_i32 = arith.constant 1 : i32
    %60 = arith.index_cast %c1_i32 : i32 to index
    %c0_9 = arith.constant 0 : index
    %61 = memref.load %arg1[%60, %c0_9] : memref<5x2xf32, #tpu.memory_space<smem>>
    %62 = arith.index_cast %c1_i32 : i32 to index
    %c1_10 = arith.constant 1 : index
    %63 = memref.load %arg1[%62, %c1_10] : memref<5x2xf32, #tpu.memory_space<smem>>
    %64 = arith.index_cast %c1_i32 : i32 to index
    %65 = memref.load %arg2[%64] : memref<5xf32, #tpu.memory_space<smem>>
    %66 = arith.mulf %65, %65 : f32
    %cst_11 = arith.constant 1.000000e+00 : f32
    %67 = arith.divf %cst_11, %66 : f32
    %cst_12 = arith.constant 0.166666672 : f32
    %68 = arith.mulf %cst_12, %67 : f32
    %cst_13 = arith.constant 0.000000e+00 : f32
    %69 = arith.subf %cst_13, %67 : f32
    %70 = vector.broadcast %61 : f32 to vector<2x128xf32>
    %71 = arith.subf %16, %70 : vector<2x128xf32>
    %72 = vector.broadcast %63 : f32 to vector<2x128xf32>
    %73 = arith.subf %21, %72 : vector<2x128xf32>
    %74 = arith.mulf %71, %71 : vector<2x128xf32>
    %75 = arith.mulf %73, %73 : vector<2x128xf32>
    %76 = arith.addf %74, %75 : vector<2x128xf32>
    %77 = vector.broadcast %69 : f32 to vector<2x128xf32>
    %78 = arith.mulf %76, %77 : vector<2x128xf32>
    %79 = math.exp %78 : vector<2x128xf32>
    %80 = vector.broadcast %68 : f32 to vector<2x128xf32>
    %81 = arith.mulf %80, %79 : vector<2x128xf32>
    %82 = arith.index_cast %c1_i32 : i32 to index
    %c0_14 = arith.constant 0 : index
    %83 = memref.load %arg3[%82, %c0_14] : memref<5x3xf32, #tpu.memory_space<smem>>
    %84 = vector.broadcast %83 : f32 to vector<2x128xf32>
    %85 = arith.mulf %81, %84 : vector<2x128xf32>
    %86 = arith.addf %49, %85 : vector<2x128xf32>
    %87 = arith.index_cast %c1_i32 : i32 to index
    %c1_15 = arith.constant 1 : index
    %88 = memref.load %arg3[%87, %c1_15] : memref<5x3xf32, #tpu.memory_space<smem>>
    %89 = vector.broadcast %88 : f32 to vector<2x128xf32>
    %90 = arith.mulf %81, %89 : vector<2x128xf32>
    %91 = arith.addf %54, %90 : vector<2x128xf32>
    %92 = arith.index_cast %c1_i32 : i32 to index
    %c2_16 = arith.constant 2 : index
    %93 = memref.load %arg3[%92, %c2_16] : memref<5x3xf32, #tpu.memory_space<smem>>
    %94 = vector.broadcast %93 : f32 to vector<2x128xf32>
    %95 = arith.mulf %81, %94 : vector<2x128xf32>
    %96 = arith.addf %59, %95 : vector<2x128xf32>
    %c2_i32_17 = arith.constant 2 : i32
    %97 = arith.index_cast %c2_i32_17 : i32 to index
    %c0_18 = arith.constant 0 : index
    %98 = memref.load %arg1[%97, %c0_18] : memref<5x2xf32, #tpu.memory_space<smem>>
    %99 = arith.index_cast %c2_i32_17 : i32 to index
    %c1_19 = arith.constant 1 : index
    %100 = memref.load %arg1[%99, %c1_19] : memref<5x2xf32, #tpu.memory_space<smem>>
    %101 = arith.index_cast %c2_i32_17 : i32 to index
    %102 = memref.load %arg2[%101] : memref<5xf32, #tpu.memory_space<smem>>
    %103 = arith.mulf %102, %102 : f32
    %cst_20 = arith.constant 1.000000e+00 : f32
    %104 = arith.divf %cst_20, %103 : f32
    %cst_21 = arith.constant 0.166666672 : f32
    %105 = arith.mulf %cst_21, %104 : f32
    %cst_22 = arith.constant 0.000000e+00 : f32
    %106 = arith.subf %cst_22, %104 : f32
    %107 = vector.broadcast %98 : f32 to vector<2x128xf32>
    %108 = arith.subf %16, %107 : vector<2x128xf32>
    %109 = vector.broadcast %100 : f32 to vector<2x128xf32>
    %110 = arith.subf %21, %109 : vector<2x128xf32>
    %111 = arith.mulf %108, %108 : vector<2x128xf32>
    %112 = arith.mulf %110, %110 : vector<2x128xf32>
    %113 = arith.addf %111, %112 : vector<2x128xf32>
    %114 = vector.broadcast %106 : f32 to vector<2x128xf32>
    %115 = arith.mulf %113, %114 : vector<2x128xf32>
    %116 = math.exp %115 : vector<2x128xf32>
    %117 = vector.broadcast %105 : f32 to vector<2x128xf32>
    %118 = arith.mulf %117, %116 : vector<2x128xf32>
    %119 = arith.index_cast %c2_i32_17 : i32 to index
    %c0_23 = arith.constant 0 : index
    %120 = memref.load %arg3[%119, %c0_23] : memref<5x3xf32, #tpu.memory_space<smem>>
    %121 = vector.broadcast %120 : f32 to vector<2x128xf32>
    %122 = arith.mulf %118, %121 : vector<2x128xf32>
    %123 = arith.addf %86, %122 : vector<2x128xf32>
    %124 = arith.index_cast %c2_i32_17 : i32 to index
    %c1_24 = arith.constant 1 : index
    %125 = memref.load %arg3[%124, %c1_24] : memref<5x3xf32, #tpu.memory_space<smem>>
    %126 = vector.broadcast %125 : f32 to vector<2x128xf32>
    %127 = arith.mulf %118, %126 : vector<2x128xf32>
    %128 = arith.addf %91, %127 : vector<2x128xf32>
    %129 = arith.index_cast %c2_i32_17 : i32 to index
    %c2_25 = arith.constant 2 : index
    %130 = memref.load %arg3[%129, %c2_25] : memref<5x3xf32, #tpu.memory_space<smem>>
    %131 = vector.broadcast %130 : f32 to vector<2x128xf32>
    %132 = arith.mulf %118, %131 : vector<2x128xf32>
    %133 = arith.addf %96, %132 : vector<2x128xf32>
    %c3_i32 = arith.constant 3 : i32
    %134 = arith.index_cast %c3_i32 : i32 to index
    %c0_26 = arith.constant 0 : index
    %135 = memref.load %arg1[%134, %c0_26] : memref<5x2xf32, #tpu.memory_space<smem>>
    %136 = arith.index_cast %c3_i32 : i32 to index
    %c1_27 = arith.constant 1 : index
    %137 = memref.load %arg1[%136, %c1_27] : memref<5x2xf32, #tpu.memory_space<smem>>
    %138 = arith.index_cast %c3_i32 : i32 to index
    %139 = memref.load %arg2[%138] : memref<5xf32, #tpu.memory_space<smem>>
    %140 = arith.mulf %139, %139 : f32
    %cst_28 = arith.constant 1.000000e+00 : f32
    %141 = arith.divf %cst_28, %140 : f32
    %cst_29 = arith.constant 0.166666672 : f32
    %142 = arith.mulf %cst_29, %141 : f32
    %cst_30 = arith.constant 0.000000e+00 : f32
    %143 = arith.subf %cst_30, %141 : f32
    %144 = vector.broadcast %135 : f32 to vector<2x128xf32>
    %145 = arith.subf %16, %144 : vector<2x128xf32>
    %146 = vector.broadcast %137 : f32 to vector<2x128xf32>
    %147 = arith.subf %21, %146 : vector<2x128xf32>
    %148 = arith.mulf %145, %145 : vector<2x128xf32>
    %149 = arith.mulf %147, %147 : vector<2x128xf32>
    %150 = arith.addf %148, %149 : vector<2x128xf32>
    %151 = vector.broadcast %143 : f32 to vector<2x128xf32>
    %152 = arith.mulf %150, %151 : vector<2x128xf32>
    %153 = math.exp %152 : vector<2x128xf32>
    %154 = vector.broadcast %142 : f32 to vector<2x128xf32>
    %155 = arith.mulf %154, %153 : vector<2x128xf32>
    %156 = arith.index_cast %c3_i32 : i32 to index
    %c0_31 = arith.constant 0 : index
    %157 = memref.load %arg3[%156, %c0_31] : memref<5x3xf32, #tpu.memory_space<smem>>
    %158 = vector.broadcast %157 : f32 to vector<2x128xf32>
    %159 = arith.mulf %155, %158 : vector<2x128xf32>
    %160 = arith.addf %123, %159 : vector<2x128xf32>
    %161 = arith.index_cast %c3_i32 : i32 to index
    %c1_32 = arith.constant 1 : index
    %162 = memref.load %arg3[%161, %c1_32] : memref<5x3xf32, #tpu.memory_space<smem>>
    %163 = vector.broadcast %162 : f32 to vector<2x128xf32>
    %164 = arith.mulf %155, %163 : vector<2x128xf32>
    %165 = arith.addf %128, %164 : vector<2x128xf32>
    %166 = arith.index_cast %c3_i32 : i32 to index
    %c2_33 = arith.constant 2 : index
    %167 = memref.load %arg3[%166, %c2_33] : memref<5x3xf32, #tpu.memory_space<smem>>
    %168 = vector.broadcast %167 : f32 to vector<2x128xf32>
    %169 = arith.mulf %155, %168 : vector<2x128xf32>
    %170 = arith.addf %133, %169 : vector<2x128xf32>
    %c4_i32_34 = arith.constant 4 : i32
    %171 = arith.index_cast %c4_i32_34 : i32 to index
    %c0_35 = arith.constant 0 : index
    %172 = memref.load %arg1[%171, %c0_35] : memref<5x2xf32, #tpu.memory_space<smem>>
    %173 = arith.index_cast %c4_i32_34 : i32 to index
    %c1_36 = arith.constant 1 : index
    %174 = memref.load %arg1[%173, %c1_36] : memref<5x2xf32, #tpu.memory_space<smem>>
    %175 = arith.index_cast %c4_i32_34 : i32 to index
    %176 = memref.load %arg2[%175] : memref<5xf32, #tpu.memory_space<smem>>
    %177 = arith.mulf %176, %176 : f32
    %cst_37 = arith.constant 1.000000e+00 : f32
    %178 = arith.divf %cst_37, %177 : f32
    %cst_38 = arith.constant 0.166666672 : f32
    %179 = arith.mulf %cst_38, %178 : f32
    %cst_39 = arith.constant 0.000000e+00 : f32
    %180 = arith.subf %cst_39, %178 : f32
    %181 = vector.broadcast %172 : f32 to vector<2x128xf32>
    %182 = arith.subf %16, %181 : vector<2x128xf32>
    %183 = vector.broadcast %174 : f32 to vector<2x128xf32>
    %184 = arith.subf %21, %183 : vector<2x128xf32>
    %185 = arith.mulf %182, %182 : vector<2x128xf32>
    %186 = arith.mulf %184, %184 : vector<2x128xf32>
    %187 = arith.addf %185, %186 : vector<2x128xf32>
    %188 = vector.broadcast %180 : f32 to vector<2x128xf32>
    %189 = arith.mulf %187, %188 : vector<2x128xf32>
    %190 = math.exp %189 : vector<2x128xf32>
    %191 = vector.broadcast %179 : f32 to vector<2x128xf32>
    %192 = arith.mulf %191, %190 : vector<2x128xf32>
    %193 = arith.index_cast %c4_i32_34 : i32 to index
    %c0_40 = arith.constant 0 : index
    %194 = memref.load %arg3[%193, %c0_40] : memref<5x3xf32, #tpu.memory_space<smem>>
    %195 = vector.broadcast %194 : f32 to vector<2x128xf32>
    %196 = arith.mulf %192, %195 : vector<2x128xf32>
    %197 = arith.addf %160, %196 : vector<2x128xf32>
    %198 = arith.index_cast %c4_i32_34 : i32 to index
    %c1_41 = arith.constant 1 : index
    %199 = memref.load %arg3[%198, %c1_41] : memref<5x3xf32, #tpu.memory_space<smem>>
    %200 = vector.broadcast %199 : f32 to vector<2x128xf32>
    %201 = arith.mulf %192, %200 : vector<2x128xf32>
    %202 = arith.addf %165, %201 : vector<2x128xf32>
    %203 = arith.index_cast %c4_i32_34 : i32 to index
    %c2_42 = arith.constant 2 : index
    %204 = memref.load %arg3[%203, %c2_42] : memref<5x3xf32, #tpu.memory_space<smem>>
    %205 = vector.broadcast %204 : f32 to vector<2x128xf32>
    %206 = arith.mulf %192, %205 : vector<2x128xf32>
    %207 = arith.addf %170, %206 : vector<2x128xf32>
    %c5_i32 = arith.constant 5 : i32
    %cst_43 = arith.constant 2.000000e-01 : f32
    %208 = vector.broadcast %cst_43 : f32 to vector<2x128xf32>
    %209 = arith.mulf %197, %208 : vector<2x128xf32>
    %cst_44 = arith.constant 1.000000e+00 : f32
    %210 = vector.broadcast %cst_44 : f32 to vector<2x128xf32>
    %211 = arith.subf %210, %209 : vector<2x128xf32>
    %c0_45 = arith.constant 0 : index
    %c0_46 = arith.constant 0 : index
    %c0_47 = arith.constant 0 : index
    %212 = vector.load %arg4[%c0_45, %c0_46, %c0_47] : memref<3x2x128xf32, #tpu.memory_space<vmem>>, vector<1x2x128xf32>
    %213 = vector.shape_cast %212 : vector<1x2x128xf32> to vector<2x128xf32>
    %214 = vector.shape_cast %211 : vector<2x128xf32> to vector<1x2x128xf32>
    tpu.vector_store %arg4[%c0_45, %c0_46, %c0_47], %214 {strides = array<i32>} : memref<3x2x128xf32, #tpu.memory_space<vmem>>, vector<1x2x128xf32>,
    %cst_48 = arith.constant 2.000000e-01 : f32
    %215 = vector.broadcast %cst_48 : f32 to vector<2x128xf32>
    %216 = arith.mulf %202, %215 : vector<2x128xf32>
    %cst_49 = arith.constant 1.000000e+00 : f32
    %217 = vector.broadcast %cst_49 : f32 to vector<2x128xf32>
    %218 = arith.subf %217, %216 : vector<2x128xf32>
    %c1_50 = arith.constant 1 : index
    %c0_51 = arith.constant 0 : index
    %c0_52 = arith.constant 0 : index
    %219 = vector.load %arg4[%c1_50, %c0_51, %c0_52] : memref<3x2x128xf32, #tpu.memory_space<vmem>>, vector<1x2x128xf32>
    %220 = vector.shape_cast %219 : vector<1x2x128xf32> to vector<2x128xf32>
    %221 = vector.shape_cast %218 : vector<2x128xf32> to vector<1x2x128xf32>
    tpu.vector_store %arg4[%c1_50, %c0_51, %c0_52], %221 {strides = array<i32>} : memref<3x2x128xf32, #tpu.memory_space<vmem>>, vector<1x2x128xf32>,
    %cst_53 = arith.constant 2.000000e-01 : f32
    %222 = vector.broadcast %cst_53 : f32 to vector<2x128xf32>
    %223 = arith.mulf %207, %222 : vector<2x128xf32>
    %cst_54 = arith.constant 1.000000e+00 : f32
    %224 = vector.broadcast %cst_54 : f32 to vector<2x128xf32>
    %225 = arith.subf %224, %223 : vector<2x128xf32>
    %c2_55 = arith.constant 2 : index
    %c0_56 = arith.constant 0 : index
    %c0_57 = arith.constant 0 : index
    %226 = vector.load %arg4[%c2_55, %c0_56, %c0_57] : memref<3x2x128xf32, #tpu.memory_space<vmem>>, vector<1x2x128xf32>
    %227 = vector.shape_cast %226 : vector<1x2x128xf32> to vector<2x128xf32>
    %228 = vector.shape_cast %225 : vector<2x128xf32> to vector<1x2x128xf32>
    tpu.vector_store %arg4[%c2_55, %c0_56, %c0_57], %228 {strides = array<i32>} : memref<3x2x128xf32, #tpu.memory_space<vmem>>, vector<1x2x128xf32>,
    return
  }
  func.func @transform_0(%arg0: i32) -> (i32, i32) {
    %c0_i32 = arith.constant 0 : i32
    %c0_i32_0 = arith.constant 0 : i32
    %c0_i32_1 = arith.constant 0 : i32
    return %c0_i32, %c0_i32_0 : i32, i32
  }
  func.func @transform_1(%arg0: i32) -> i32 {
    %c0_i32 = arith.constant 0 : i32
    %c0_i32_0 = arith.constant 0 : i32
    return %c0_i32 : i32
  }
  func.func @transform_2(%arg0: i32) -> (i32, i32) {
    %c0_i32 = arith.constant 0 : i32
    %c0_i32_0 = arith.constant 0 : i32
    %c0_i32_1 = arith.constant 0 : i32
    return %c0_i32, %c0_i32_0 : i32, i32
  }
  func.func @transform_3(%arg0: i32) -> (i32, i32, i32) {
    %c0_i32 = arith.constant 0 : i32
    %c0_i32_0 = arith.constant 0 : i32
    %c0_i32_1 = arith.constant 0 : i32
    return %c0_i32, %arg0, %c0_i32_0 : i32, i32, i32
  }
}

</mosaic_0001>

<bundles_post_ra>
// kernel: tpu_custom_call.1
= control target key start
LH: loop header
LB: loop body
LE: loop exit
PB: predicated region body
PF: predicated region fallthrough
CT: control target
= control target key end

     0   :  { %8 = vsyncpa [#allocation4], 0  ;;  %s631_s0 = inlined_call_operand.vmem [shape: f32[5,2], index: 0, kind: input, shape index: {}]   ;;  %s632_s1 = inlined_call_operand.vmem [shape: f32[5], index: 1, kind: input, shape index: {}]   ;;  %s633_s2 = inlined_call_operand.vmem [shape: f32[5,3], index: 2, kind: input, shape index: {}]   ;;  %s634_s3 = inlined_call_operand.hbm [shape: f32[3,2,128], index: 3, kind: output, shape index: {}]  }
   0x1   :  { %9 = vsyncpa [#allocation6], 0  ;;  %s25_s14 = sshll.u32 %s632_s1, 4  ;;  %s26_s14 = int_to_ptr.vmem [resolvable:$true] %s25_s14 }
   0x2   :  { %10 = vsyncpa [#allocation3], 0  ;;  %s16_s17 = sshll.u32 %s631_s0, 4  ;;  %s465_s18 = smov [#allocation5]   ;;  %s17_s17 = int_to_ptr.vmem [resolvable:$true] %s16_s17 }
   0x3   :  { %28 = dma.vmem_to_smem %s26_s14, 16, %s465_s18, [#allocation6]  }
   0x4   :  { %s466_s19 = smov [#allocation2]   ;;  %s34_s22 = sshll.u32 %s633_s2, 4  ;;  %s35_s22 = int_to_ptr.vmem [resolvable:$true] %s34_s22 }
   0x5   :  { %19 = dma.vmem_to_smem %s17_s17, 128, %s466_s19, [#allocation4]  }
   0x6   :  { %s467_s23 = smov [#allocation7]  }
   0x7   :  { %37 = dma.vmem_to_smem %s35_s22, 128, %s467_s23, [#allocation6]  }
   0x8   :  { %459 = dma.done.wait [#allocation4], 128  }
   0x9   :  { %460 = vsyncadd [#allocation4], 4294967168 }
   0xa   :  { %461 = dma.done.wait [#allocation6], 144  }
   0xb   :  { %462 = vsyncadd [#allocation6], 4294967152 }
   0xc   :  { %50 = sfence }
   0xd   :  { %s70_s1 = sld [smem:[#allocation5]]  ;;  %v51_v62 = vlaneseq }
   0xe   :  { %s341_s24 = sld [smem:[#allocation5 + $0x1]] }
   0xf   :  { %s347_s0 = sld [smem:[#allocation5 + $0x2]]  ;;  %v52_v63 = vshrl.u32 %v51_v62, 7 }
  0x10   :  { %s353_s25 = sld [smem:[#allocation5 + $0x3]] }
  0x11   :  { %s359_s26 = sld [smem:[#allocation5 + $0x4]] }
  0x12   :  { %s68_s4 = sld [smem:[#allocation2]] }
  0x13   :  { %s71_s27 = smul.f32 %s70_s1, %s70_s1  ;;  %s336_s5 = sld [smem:[#allocation2 + $0x1]] }
  0x14   :  { %s118_s28 = smul.f32 %s341_s24, %s341_s24  ;;  %s339_s6 = sld [smem:[#allocation2 + $0x80]] }
  0x15   :  { %v72_v0 = vstv %s71_s27  ;;  %s165_s29 = smul.f32 %s347_s0, %s347_s0  ;;  %s340_s7 = sld [smem:[#allocation2 + $0x81]] }
  0x16   :  { %379 = vrcp.f32 %v72_v0  ;;  %s212_s30 = smul.f32 %s353_s25, %s353_s25  ;;  %v119_v1 = vstv %s118_s28  ;;  %v82_v3 = vand.u32 2147483647, %v72_v0  ;;  %v84_v4 = vand.u32 2147483648, %v72_v0  ;;  %s345_s8 = sld [smem:[#allocation2 + $0x100]] }
  0x17   :  { %v166_v2 = vstv %s165_s29  ;;  %s259_s2 = smul.f32 %s359_s26, %s359_s26  ;;  %381 = vrcp.f32 %v119_v1  ;;  %v129_v5 = vand.u32 2147483647, %v119_v1  ;;  %v131_v8 = vand.u32 2147483648, %v119_v1  ;;  %s346_s9 = sld [smem:[#allocation2 + $0x101]] }
  0x18   :  { %383 = vrcp.f32 %v166_v2  ;;  %v213_v6 = vstv %s212_s30  ;;  %v176_v10 = vand.u32 2147483647, %v166_v2  ;;  %v178_v11 = vand.u32 2147483648, %v166_v2  ;;  %s351_s10 = sld [smem:[#allocation2 + $0x180]] }
  0x19   :  { %v500_v7 = vstv %s259_s2  ;;  %385 = vrcp.f32 %v213_v6  ;;  %vm78_vm0 = vweird.f32 %v72_v0  ;;  %vm502_vm1 = vcmp.eq.f32.partialorder %v82_v3, 8.507059e+37  ;;  %s352_s11 = sld [smem:[#allocation2 + $0x181]] }
  0x1a   :  { %387 = vrcp.f32 %v500_v7  ;;  %v85_v15 = vor.u32 1.1754944e-38, %v84_v4  ;;  %vm125_vm2 = vweird.f32 %v119_v1  ;;  %vm507_vm3 = vcmp.eq.f32.partialorder %v129_v5, 8.507059e+37  ;;  %s557_s12 = sld [smem:[#allocation2 + $0x200]] }
  0x1b   :  { %vm172_vm4 = vweird.f32 %v166_v2  ;;  %v132_v20 = vor.u32 1.1754944e-38, %v131_v8  ;;  %vm511_vm6 = vcmp.eq.f32.partialorder %v176_v10, 8.507059e+37  ;;  %v179_v23 = vor.u32 1.1754944e-38, %v178_v11  ;;  %s559_s13 = sld [smem:[#allocation2 + $0x201]] }
  0x1c   :  { %v380_v9 = vpop.eup %379  ;;  %vm219_vm7 = vweird.f32 %v213_v6  ;;  %v223_v27 = vand.u32 2147483647, %v213_v6  ;;  %v225_v31 = vand.u32 2147483648, %v213_v6  ;;  %vm266_vm11 = vweird.f32 %v500_v7  ;;  %s561_s14 = sld [smem:[#allocation7]] }
  0x1d   :  { %v74_v12 = vmul.f32 %v380_v9, %v72_v0  ;;  %v382_v14 = vpop.eup %381  ;;  %vm79_vm5 = vweird.f32 %v380_v9  ;;  %v270_v35 = vand.u32 2147483647, %v500_v7  ;;  %v272_v43 = vand.u32 2147483648, %v500_v7  ;;  %s563_s15 = sld [smem:[#allocation7 + $0x1]] }
  0x1e   :  { %v384_v17 = vpop.eup %383  ;;  %v121_v19 = vmul.f32 %v382_v14, %v119_v1  ;;  %vm126_vm8 = vweird.f32 %v382_v14  ;;  %vm516_vm9 = vmor %vm78_vm0, %vm79_vm5  ;;  %v226_v50 = vor.u32 1.1754944e-38, %v225_v31  ;;  %v57_v0 = vand.u32 127, %v51_v62  ;;  %s565_s16 = sld [smem:[#allocation7 + $0x2]] }
  0x1f   :  { %v75_v18 = vsub.f32 1.0, %v74_v12  ;;  %v168_v21 = vmul.f32 %v384_v17, %v166_v2  ;;  %v386_v24 = vpop.eup %385  ;;  %vm173_vm10 = vweird.f32 %v384_v17  ;;  %vm523_vm12 = vmor %vm125_vm2, %vm126_vm8  ;;  %vm224_vm2 = vcmp.eq.f32.partialorder %v223_v27, 8.507059e+37  ;;  %s569_s17 = sld [smem:[#allocation7 + $0x80]] }
  0x20   :  { %v122_v26 = vsub.f32 1.0, %v121_v19  ;;  %v215_v30 = vmul.f32 %v386_v24, %v213_v6  ;;  %v388_v32 = vpop.eup %387  ;;  %vm220_vm13 = vweird.f32 %v386_v24  ;;  %vm532_vm14 = vmor %vm172_vm4, %vm173_vm10  ;;  %v273_v56 = vor.u32 1.1754944e-38, %v272_v43  ;;  %s571_s18 = sld [smem:[#allocation7 + $0x81]] }
  0x21   :  { %v76_v25 = vmul.f32 %v380_v9, %v75_v18  ;;  %v169_v29 = vsub.f32 1.0, %v168_v21  ;;  %v262_v39 = vmul.f32 %v388_v32, %v500_v7  ;;  %vm267_vm15 = vweird.f32 %v388_v32  ;;  %vm542_vm0 = vmor %vm219_vm7, %vm220_vm13  ;;  %s575_s20 = sld [smem:[#allocation7 + $0x82]] }
  0x22   :  { %v123_v34 = vmul.f32 %v382_v14, %v122_v26  ;;  %v216_v38 = vsub.f32 1.0, %v215_v30  ;;  %v58_v1 = vmul.u32 128, %v52_v63  ;;  %v90_v11 = vstv %s68_s4  ;;  %s580_s23 = sld [smem:[#allocation7 + $0x100]] }
  0x23   :  { %v77_v33 = vadd.f32 %v380_v9, %v76_v25  ;;  %v170_v37 = vmul.f32 %v384_v17, %v169_v29  ;;  %v263_v47 = vsub.f32 1.0, %v262_v39  ;;  %v92_v12 = vstv %s336_s5  ;;  %s585_s0 = sld [smem:[#allocation7 + $0x101]] }
  0x24   :  { %v124_v41 = vadd.f32 %v382_v14, %v123_v34  ;;  %v217_v46 = vmul.f32 %v386_v24, %v216_v38  ;;  %v59_v2 = vadd.s32 %v58_v1, %v57_v0  ;;  %v139_v16 = vstv %s340_s7  ;;  %s588_s26 = sld [smem:[#allocation7 + $0x102]] }
  0x25   :  { %v81_v40 = vsel %vm516_vm9, %v380_v9, %v77_v33  ;;  %v171_v45 = vadd.f32 %v384_v17, %v170_v37  ;;  %v264_v54 = vmul.f32 %v388_v32, %v263_v47  ;;  %v186_v18 = vstv %s346_s9  ;;  %s593_s29 = sld [smem:[#allocation7 + $0x180]] }
  0x26   :  { %v86_v44 = vsel %vm502_vm1, %v85_v15, %v81_v40  ;;  %v128_v48 = vsel %vm523_vm12, %v382_v14, %v124_v41  ;;  %v218_v53 = vadd.f32 %v386_v24, %v217_v46  ;;  %vm268_vm1 = vmor %vm266_vm11, %vm267_vm15  ;;  %v60_v3 = vshra.s32 %v59_v2, 4  ;;  %s599_s5 = sld [smem:[#allocation7 + $0x181]] }
  0x27   :  { %363 = vpush %v86_v44  ;;  %v133_v51 = vsel %vm507_vm3, %v132_v20, %v128_v48  ;;  %v175_v52 = vsel %vm532_vm14, %v384_v17, %v171_v45  ;;  %v265_v58 = vadd.f32 %v388_v32, %v264_v54  ;;  %vm271_vm3 = vcmp.eq.f32.partialorder %v270_v35, 8.507059e+37 }
  0x28   :  { %365 = vpush %v133_v51  ;;  %v180_v55 = vsel %vm511_vm6, %v179_v23, %v175_v52  ;;  %v222_v57 = vsel %vm542_vm0, %v386_v24, %v218_v53  ;;  %v61_v4 = vand.u32 15, %v59_v2  ;;  %v62_v5 = vcvt.s32.f32 %v60_v3 }
  0x29   :  { %367 = vpush %v180_v55  ;;  %v227_v59 = vsel %vm224_vm2, %v226_v50, %v222_v57  ;;  %v269_v60 = vsel %vm268_vm1, %v388_v32, %v265_v58  ;;  %v137_v15 = vstv %s339_s6  ;;  %v184_v17 = vstv %s345_s8  ;;  %s601_s6 = sld [smem:[#allocation7 + $0x182]] }
  0x2a   :  { %369 = vpush %v227_v59  ;;  %v274_v61 = vsel %vm271_vm3, %v273_v56, %v269_v60  ;;  %v65_v6 = vcvt.s32.f32 %v61_v4  ;;  %v63_v7 = vmul.f32 0.13333334, %v62_v5  ;;  %v231_v23 = vstv %s351_s10  ;;  %s604_s8 = sld [smem:[#allocation7 + $0x200]] }
  0x2b   :  { %371 = vpush %v274_v61  ;;  %v233_v24 = vstv %s352_s11  ;;  %v278_v27 = vstv %s557_s12  ;;  %v280_v28 = vstv %s559_s13  ;;  %v104_v60 = vstv %s561_s14  ;;  %s610_s10 = sld [smem:[#allocation7 + $0x201]]  ;;  %s468_s14 = smov [#allocation8]  }
  0x2c   :  { %v66_v8 = vmul.f32 0.13333334, %v65_v6  ;;  %v334_v9 = vadd.f32 -1.0, %v63_v7  ;;  %v108_v61 = vstv %s563_s15  ;;  %v112_v0 = vstv %s565_s16  ;;  %s614_s11 = sld [smem:[#allocation7 + $0x202]]  ;;  %s318_s15 = sshll.u32 %s468_s14, 4  ;;  %s319_s15 = int_to_ptr.vmem [resolvable:$true] %s318_s15 }
  0x2d   :  { %v151_v3 = vstv %s569_s17  ;;  %v155_v4 = vstv %s571_s18  ;;  %v159_v7 = vstv %s575_s20  ;;  %s320_s18 = sshll.u32 %s634_s3, 4  ;;  %s470_s20 = smov 2   ;;  %s321_s18 = int_to_ptr.hbm [resolvable:$true] %s320_s18 }
  0x2e   :  { %v335_v10 = vadd.f32 -1.0, %v66_v8  ;;  %v91_v13 = vsub.f32 %v334_v9, %v90_v11  ;;  %v138_v19 = vsub.f32 %v334_v9, %v137_v15  ;;  %v185_v25 = vsub.f32 %v334_v9, %v184_v17 }
  0x2f   :  { %v232_v31 = vsub.f32 %v334_v9, %v231_v23  ;;  %v279_v36 = vsub.f32 %v334_v9, %v278_v27  ;;  %v198_v8 = vstv %s580_s23  ;;  %v202_v15 = vstv %s585_s0 }
  0x30   :  { %v93_v14 = vsub.f32 %v335_v10, %v92_v12  ;;  %v140_v20 = vsub.f32 %v335_v10, %v139_v16  ;;  %v94_v21 = vmul.f32 %v91_v13, %v91_v13  ;;  %v187_v26 = vsub.f32 %v335_v10, %v186_v18 }
  0x31   :  { %v141_v29 = vmul.f32 %v138_v19, %v138_v19  ;;  %v234_v32 = vsub.f32 %v335_v10, %v233_v24  ;;  %v188_v34 = vmul.f32 %v185_v25, %v185_v25  ;;  %v281_v37 = vsub.f32 %v335_v10, %v280_v28 }
  0x32   :  { %v95_v22 = vmul.f32 %v93_v14, %v93_v14  ;;  %v142_v30 = vmul.f32 %v140_v20, %v140_v20  ;;  %v189_v35 = vmul.f32 %v187_v26, %v187_v26  ;;  %v235_v39 = vmul.f32 %v232_v31, %v232_v31 }
  0x33   :  { %v236_v40 = vmul.f32 %v234_v32, %v234_v32  ;;  %v282_v44 = vmul.f32 %v279_v36, %v279_v36  ;;  %v283_v45 = vmul.f32 %v281_v37, %v281_v37  ;;  %v206_v16 = vstv %s588_s26 }
  0x34   :  { %v96_v33 = vadd.f32 %v95_v22, %v94_v21  ;;  %v143_v38 = vadd.f32 %v142_v30, %v141_v29  ;;  %v190_v43 = vadd.f32 %v189_v35, %v188_v34  ;;  %v245_v17 = vstv %s593_s29 }
  0x35   :  { %v237_v49 = vadd.f32 %v236_v40, %v235_v39  ;;  %v284_v53 = vadd.f32 %v283_v45, %v282_v44  ;;  %v249_v24 = vstv %s599_s5  ;;  %v253_v25 = vstv %s601_s6 }
  0x36   :  { %v292_v26 = vstv %s604_s8  ;;  %v300_v39 = vstv %s614_s11 }
  0x58   :  { %s573_s19 = spop %363 }
  0x59   :  { %s89_s21 = ssub.f32 0.0, %s573_s19  ;;  %s578_s22 = spop %365 }
  0x5a   :  { %s136_s1 = ssub.f32 0.0, %s578_s22  ;;  %s583_s24 = spop %367 }
  0x5b   :  { %v97_v41 = vstv %s89_s21  ;;  %s183_s25 = ssub.f32 0.0, %s583_s24  ;;  %s590_s27 = spop %369 }
  0x5c   :  { %v98_v42 = vmul.f32 %v97_v41, %v96_v33  ;;  %v144_v46 = vstv %s136_s1  ;;  %s230_s28 = ssub.f32 0.0, %s590_s27  ;;  %s595_s30 = spop %371 }
  0x5d   :  { %v145_v48 = vmul.f32 %v144_v46, %v143_v38  ;;  %v191_v50 = vstv %s183_s25  ;;  %s277_s2 = ssub.f32 0.0, %s595_s30  ;;  %s88_s4 = smul.f32 0.16666667, %s573_s19  ;;  %v296_v38 = vstv %s610_s10 }
  0x5e   :  { %v99_v47 = vmul.f32 1.442695, %v98_v42  ;;  %v192_v52 = vmul.f32 %v191_v50, %v190_v43  ;;  %v238_v54 = vstv %s230_s28  ;;  %s135_s7 = smul.f32 0.16666667, %s578_s22  ;;  %s469_s19 = smov 32  }
  0x5f   :  { %v146_v51 = vmul.f32 1.442695, %v145_v48  ;;  %v239_v56 = vmul.f32 %v238_v54, %v237_v49  ;;  %v285_v57 = vstv %s277_s2  ;;  %v101_v63 = vstv %s88_s4  ;;  %s182_s9 = smul.f32 0.16666667, %s583_s24 }
  0x60   :  { %389 = vpow2.f32 %v99_v47  ;;  %v193_v55 = vmul.f32 1.442695, %v192_v52  ;;  %v286_v59 = vmul.f32 %v285_v57, %v284_v53  ;;  %v148_v6 = vstv %s135_s7  ;;  %s229_s12 = smul.f32 0.16666667, %s590_s27 }
  0x61   :  { %391 = vpow2.f32 %v146_v51  ;;  %v240_v58 = vmul.f32 1.442695, %v239_v56  ;;  %v195_v14 = vstv %s182_s9  ;;  %s276_s13 = smul.f32 0.16666667, %s595_s30 }
  0x62   :  { %393 = vpow2.f32 %v193_v55  ;;  %v287_v1 = vmul.f32 1.442695, %v286_v59  ;;  %v242_v23 = vstv %s229_s12 }
  0x63   :  { %395 = vpow2.f32 %v240_v58  ;;  %v289_v35 = vstv %s276_s13 }
  0x64   :  { %397 = vpow2.f32 %v287_v1 }
  0x66   :  { %v390_v62 = vpop.eup %389 }
  0x67   :  { %v102_v2 = vmul.f32 %v390_v62, %v101_v63  ;;  %v392_v5 = vpop.eup %391 }
  0x68   :  { %v149_v12 = vmul.f32 %v392_v5, %v148_v6  ;;  %v394_v13 = vpop.eup %393 }
  0x69   :  { %v105_v9 = vmul.f32 %v104_v60, %v102_v2  ;;  %v109_v10 = vmul.f32 %v108_v61, %v102_v2  ;;  %v113_v11 = vmul.f32 %v112_v0, %v102_v2  ;;  %v196_v21 = vmul.f32 %v394_v13, %v195_v14  ;;  %v396_v22 = vpop.eup %395 }
  0x6a   :  { %v152_v18 = vmul.f32 %v151_v3, %v149_v12  ;;  %v156_v19 = vmul.f32 %v155_v4, %v149_v12  ;;  %v160_v20 = vmul.f32 %v159_v7, %v149_v12  ;;  %v398_v31 = vpop.eup %397  ;;  %v243_v34 = vmul.f32 %v396_v22, %v242_v23 }
  0x6b   :  { %v199_v30 = vmul.f32 %v198_v8, %v196_v21  ;;  %v203_v32 = vmul.f32 %v202_v15, %v196_v21  ;;  %v207_v33 = vmul.f32 %v206_v16, %v196_v21  ;;  %v290_v37 = vmul.f32 %v398_v31, %v289_v35 }
  0x6c   :  { %v153_v27 = vadd.f32 %v152_v18, %v105_v9  ;;  %v157_v28 = vadd.f32 %v156_v19, %v109_v10  ;;  %v161_v29 = vadd.f32 %v160_v20, %v113_v11  ;;  %v246_v42 = vmul.f32 %v245_v17, %v243_v34 }
  0x6d   :  { %v250_v43 = vmul.f32 %v249_v24, %v243_v34  ;;  %v254_v44 = vmul.f32 %v253_v25, %v243_v34  ;;  %v293_v47 = vmul.f32 %v292_v26, %v290_v37  ;;  %v297_v48 = vmul.f32 %v296_v38, %v290_v37 }
  0x6e   :  { %v200_v36 = vadd.f32 %v199_v30, %v153_v27  ;;  %v204_v40 = vadd.f32 %v203_v32, %v157_v28  ;;  %v208_v41 = vadd.f32 %v207_v33, %v161_v29  ;;  %v301_v50 = vmul.f32 %v300_v39, %v290_v37 }
  0x70   :  { %v247_v45 = vadd.f32 %v246_v42, %v200_v36  ;;  %v251_v46 = vadd.f32 %v250_v43, %v204_v40  ;;  %v255_v49 = vadd.f32 %v254_v44, %v208_v41 }
  0x72   :  { %v294_v51 = vadd.f32 %v293_v47, %v247_v45  ;;  %v298_v52 = vadd.f32 %v297_v48, %v251_v46  ;;  %v302_v53 = vadd.f32 %v301_v50, %v255_v49 }
  0x74   :  { %v303_v54 = vmul.f32 0.2, %v294_v51  ;;  %v306_v55 = vmul.f32 0.2, %v298_v52  ;;  %v310_v56 = vmul.f32 0.2, %v302_v53 }
  0x76   :  { %v304_v57 = vsub.f32 1.0, %v303_v54  ;;  %v307_v58 = vsub.f32 1.0, %v306_v55  ;;  %v311_v59 = vsub.f32 1.0, %v310_v56 }
  0x78   :  { %305 = vst [vmem:[#allocation8] sm:$0x3] %v304_v57 }
  0x79   :  { %309 = vst [vmem:[#allocation8 + $0x2] sm:$0x3] %v307_v58 }
  0x7a   :  { %313 = vst [vmem:[#allocation8 + $0x4] sm:$0x3] %v311_v59 }
  0x7b   :  { %326 = dma.vmem_to_hbm [thread:$0]  %s319_s15, 96, %s321_s18, [#allocation3], %s469_s19, %s469_s19, %s470_s20  }
  0x7c   :  { %463 = dma.done.wait [#allocation3], 96  }
  0x7d   :  { %464 = vsyncadd [#allocation3], 4294967200 }
  0x7e   :  { %331 = vsyncpa [#allocation3], 1 }
  0x7f   :  { %332 = vsyncpa [#allocation4], 1 }
  0x80   :  { %333 = vsyncpa [#allocation6], 1 }

</bundles_post_ra>
